<compile_context>
chip_gen: v7x
topology: tpu7x:2x2x1
jax: 0.10.0
libtpu: 0.0.40
codegen_flags: <defaults>
</compile_context>

<pallas_src>
import functools

import jax
import jax.numpy as jnp
from jax.experimental import pallas as pl
from jax.experimental.pallas import tpu as pltpu


def _random_shift_kernel(shift_ref, x_ref, o_ref, *, pad):
    """One grid step == one block of `bblk` batch elements.

    shift_ref : SMEM int32 (2*n,)      -- interleaved (sx, sy) shifts in [0, 2*pad]
    x_ref     : VMEM (bblk, C, H, W)   -- original (unpadded) images
    o_ref     : VMEM (bblk, C, H, W)   -- shifted output
    """
    bblk, c, h, w = x_ref.shape
    blk_start = pl.program_id(0) * bblk

    # Hoisted iotas, shared by the row and column selectors (H == W).
    k0 = jax.lax.broadcasted_iota(jnp.int32, (h, w), 0)  # varies along dim 0
    k1 = jax.lax.broadcasted_iota(jnp.int32, (h, w), 1)  # varies along dim 1

    for b in range(bblk):  # bblk is small & static -> unrolled
        sx = shift_ref[2 * (blk_start + b)]
        sy = shift_ref[2 * (blk_start + b) + 1]

        # Column selection (transposed): sxT[k, j] = 1 iff output column j
        # reads source column k = clamp(j + sx - pad, 0, W-1).
        sxT = (k0 == jnp.clip(k1 + (sx - pad), 0, w - 1)).astype(jnp.float32)
        # Row selection: syM[i, r] = 1 iff output row i reads source row
        # r = clamp(i + sy - pad, 0, H-1).
        syM = (k1 == jnp.clip(k0 + (sy - pad), 0, h - 1)).astype(jnp.float32)

        # Column crop fused over channels: one (C*H, W) @ (W, W) MXU matmul.
        xb = x_ref[b].astype(jnp.float32).reshape(c * h, w)
        t = jnp.dot(xb, sxT, preferred_element_type=jnp.float32).reshape(c, h, w)

        # Row crop (selection matrix shared across channels; C small & static).
        for cc in range(c):
            o_ref[b, cc] = jnp.dot(
                syM, t[cc], preferred_element_type=jnp.float32
            ).astype(o_ref.dtype)


def _pick_batch_block(n, img_bytes, target_bytes=2 << 20):
    """Largest divisor of n whose input block stays under ~target_bytes, while
    keeping >= 2 grid steps when possible (v7x has 2 TensorCores per chip)."""
    bblk = max(1, min(n, target_bytes // max(img_bytes, 1)))
    while n % bblk != 0:
        bblk -= 1
    if n >= 2 and n // bblk < 2:
        bblk = max(d for d in range(1, n // 2 + 1) if n % d == 0)
    return bblk


def random_shifts_aug(x, pad, key, *, block_n=None):
    """JAX/Pallas equivalent of RandomShiftsAug(pad)(x) for NCHW float input.

    Returns (augmented, shift) where shift is int32 (n, 2) = (sx, sy) per image.
    """
    n, c, h, w = x.shape
    assert h == w

    # Glue: random integer pixel shift in [0, 2*pad], matching
    # torch.randint(0, 2*pad + 1) in the module (RNG stream differs, of course).
    shift = jax.random.randint(key, (n, 2), 0, 2 * pad + 1, dtype=jnp.int32)
    shift_flat = shift.reshape(-1)  # flat 1-D int32 -> tiny SMEM footprint

    img_bytes = c * h * w * x.dtype.itemsize
    bblk = block_n if block_n is not None else _pick_batch_block(n, img_bytes)
    assert n % bblk == 0

    out = pl.pallas_call(
        functools.partial(_random_shift_kernel, pad=pad),
        out_shape=jax.ShapeDtypeStruct((n, c, h, w), x.dtype),
        grid_spec=pltpu.PrefetchScalarGridSpec(
            num_scalar_prefetch=1,  # shift_flat lands in SMEM
            grid=(n // bblk,),
            in_specs=[pl.BlockSpec((bblk, c, h, w), lambda i, s: (i, 0, 0, 0))],
            out_specs=pl.BlockSpec((bblk, c, h, w), lambda i, s: (i, 0, 0, 0)),
        ),
        compiler_params=pltpu.CompilerParams(
            dimension_semantics=("parallel",),   # batch blocks are independent
            vmem_limit_bytes=32 * 1024 * 1024,   # ~2 MiB blocks -> safe on v5e/v6e/v7x
        ),
    )(shift_flat, x)
    return out, shift


if __name__ == "__main__":
    PAD = 4
    N, C, H, W = 2, 4, 16, 16

    key = jax.random.PRNGKey(0)
    kx, ks = jax.random.split(key)
    x = jax.random.normal(kx, (N, C, H, W), dtype=jnp.float32)

    out, shift = random_shifts_aug(x, PAD, ks)
    out = jax.block_until_ready(out)

    # Reference: integer shifts mean the result is exactly a crop of the
    # replicate-padded image starting at (sy, sx).
    x_pad = jnp.pad(x, ((0, 0), (0, 0), (PAD, PAD), (PAD, PAD)), mode="edge")

    def _ref_one(xp, s):
        return jax.lax.dynamic_slice(xp, (jnp.int32(0), s[1], s[0]), (C, H, W))

    expected = jax.vmap(_ref_one)(x_pad, shift)
    assert out.shape == (N, C, H, W)
    assert bool(jnp.allclose(out, expected, atol=1e-6, rtol=1e-6))

    print("KERNEL_OK")
</pallas_src>

<mosaic_0001>
module attributes {stable_mosaic.version = 11 : i64} {
  func.func @_random_shift_kernel(%arg0: i32, %arg1: memref<4xi32, #tpu.memory_space<smem>>, %arg2: memref<1x4x16x16xf32, #tpu.memory_space<vmem>>, %arg3: memref<1x4x16x16xf32, #tpu.memory_space<vmem>>) attributes {dimension_semantics = [#tpu.dimension_semantics<parallel>], iteration_bounds = array<i64: 2>, scalar_prefetch = 1 : i64, scratch_operands = 0 : i64, tpu.core_type = #tpu.core_type<tc>, window_params = [{transform_indices = @transform_0, window_bounds = array<i64: 1, 4, 16, 16>}, {transform_indices = @transform_1, window_bounds = array<i64: 1, 4, 16, 16>}]} {
    %c1_i32 = arith.constant 1 : i32
    %0 = arith.muli %arg0, %c1_i32 : i32
    %1 = tpu.iota {dimensions = array<i32: 0>} : vector<16x16xi32>
    %2 = tpu.iota {dimensions = array<i32: 1>} : vector<16x16xi32>
    %c0_i32 = arith.constant 0 : i32
    %3 = arith.addi %0, %c0_i32 : i32
    %c2_i32 = arith.constant 2 : i32
    %4 = arith.muli %c2_i32, %3 : i32
    %5 = arith.index_cast %4 : i32 to index
    %6 = memref.load %arg1[%5] : memref<4xi32, #tpu.memory_space<smem>>
    %c0_i32_0 = arith.constant 0 : i32
    %7 = arith.addi %0, %c0_i32_0 : i32
    %c2_i32_1 = arith.constant 2 : i32
    %8 = arith.muli %c2_i32_1, %7 : i32
    %c1_i32_2 = arith.constant 1 : i32
    %9 = arith.addi %8, %c1_i32_2 : i32
    %10 = arith.index_cast %9 : i32 to index
    %11 = memref.load %arg1[%10] : memref<4xi32, #tpu.memory_space<smem>>
    %c4_i32 = arith.constant 4 : i32
    %12 = arith.subi %6, %c4_i32 : i32
    %13 = vector.broadcast %12 : i32 to vector<16x16xi32>
    %14 = arith.addi %2, %13 : vector<16x16xi32>
    %c0_i32_3 = arith.constant 0 : i32
    %c15_i32 = arith.constant 15 : i32
    %15 = vector.broadcast %c0_i32_3 : i32 to vector<16x16xi32>
    %16 = arith.maxsi %15, %14 : vector<16x16xi32>
    %17 = vector.broadcast %c15_i32 : i32 to vector<16x16xi32>
    %18 = arith.minsi %17, %16 : vector<16x16xi32>
    %19 = arith.cmpi eq, %1, %18 : vector<16x16xi32>
    %20 = arith.extui %19 : vector<16x16xi1> to vector<16x16xi32>
    %21 = arith.sitofp %20 : vector<16x16xi32> to vector<16x16xf32>
    %c4_i32_4 = arith.constant 4 : i32
    %22 = arith.subi %11, %c4_i32_4 : i32
    %23 = vector.broadcast %22 : i32 to vector<16x16xi32>
    %24 = arith.addi %1, %23 : vector<16x16xi32>
    %c0_i32_5 = arith.constant 0 : i32
    %c15_i32_6 = arith.constant 15 : i32
    %25 = vector.broadcast %c0_i32_5 : i32 to vector<16x16xi32>
    %26 = arith.maxsi %25, %24 : vector<16x16xi32>
    %27 = vector.broadcast %c15_i32_6 : i32 to vector<16x16xi32>
    %28 = arith.minsi %27, %26 : vector<16x16xi32>
    %29 = arith.cmpi eq, %2, %28 : vector<16x16xi32>
    %30 = arith.extui %29 : vector<16x16xi1> to vector<16x16xi32>
    %31 = arith.sitofp %30 : vector<16x16xi32> to vector<16x16xf32>
    %c0 = arith.constant 0 : index
    %c0_7 = arith.constant 0 : index
    %c0_8 = arith.constant 0 : index
    %c0_9 = arith.constant 0 : index
    %32 = vector.load %arg2[%c0, %c0_7, %c0_8, %c0_9] : memref<1x4x16x16xf32, #tpu.memory_space<vmem>>, vector<1x4x16x16xf32>
    %33 = vector.shape_cast %32 : vector<1x4x16x16xf32> to vector<4x16x16xf32>
    %34 = vector.shape_cast %33 : vector<4x16x16xf32> to vector<64x16xf32>
    %cst = arith.constant dense<0.000000e+00> : vector<64x16xf32>
    %35 = tpu.matmul %34, %21, %cst {dimension_numbers = #tpu.dot_dimension_numbers<[1], [0], [0], [1], [0, 0, 1, 1], [], []>} : vector<64x16xf32>, vector<16x16xf32>, vector<64x16xf32> -> vector<64x16xf32>
    %36 = vector.shape_cast %35 : vector<64x16xf32> to vector<4x16x16xf32>
    %37 = vector.extract_strided_slice %36 {offsets = [0, 0, 0], sizes = [1, 16, 16], strides = [1, 1, 1]} : vector<4x16x16xf32> to vector<1x16x16xf32>
    %38 = vector.shape_cast %37 : vector<1x16x16xf32> to vector<16x16xf32>
    %cst_10 = arith.constant dense<0.000000e+00> : vector<16x16xf32>
    %39 = tpu.matmul %31, %38, %cst_10 {dimension_numbers = #tpu.dot_dimension_numbers<[1], [0], [0], [1], [0, 0, 1, 1], [], []>} : vector<16x16xf32>, vector<16x16xf32>, vector<16x16xf32> -> vector<16x16xf32>
    %c0_11 = arith.constant 0 : index
    %c0_12 = arith.constant 0 : index
    %c0_13 = arith.constant 0 : index
    %c0_14 = arith.constant 0 : index
    %40 = vector.load %arg3[%c0_11, %c0_12, %c0_13, %c0_14] : memref<1x4x16x16xf32, #tpu.memory_space<vmem>>, vector<1x1x16x16xf32>
    %41 = vector.shape_cast %40 : vector<1x1x16x16xf32> to vector<16x16xf32>
    %42 = vector.shape_cast %39 : vector<16x16xf32> to vector<1x1x16x16xf32>
    tpu.vector_store %arg3[%c0_11, %c0_12, %c0_13, %c0_14], %42 {strides = array<i32>} : memref<1x4x16x16xf32, #tpu.memory_space<vmem>>, vector<1x1x16x16xf32>,
    %43 = vector.extract_strided_slice %36 {offsets = [1, 0, 0], sizes = [1, 16, 16], strides = [1, 1, 1]} : vector<4x16x16xf32> to vector<1x16x16xf32>
    %44 = vector.shape_cast %43 : vector<1x16x16xf32> to vector<16x16xf32>
    %cst_15 = arith.constant dense<0.000000e+00> : vector<16x16xf32>
    %45 = tpu.matmul %31, %44, %cst_15 {dimension_numbers = #tpu.dot_dimension_numbers<[1], [0], [0], [1], [0, 0, 1, 1], [], []>} : vector<16x16xf32>, vector<16x16xf32>, vector<16x16xf32> -> vector<16x16xf32>
    %c0_16 = arith.constant 0 : index
    %c1 = arith.constant 1 : index
    %c0_17 = arith.constant 0 : index
    %c0_18 = arith.constant 0 : index
    %46 = vector.load %arg3[%c0_16, %c1, %c0_17, %c0_18] : memref<1x4x16x16xf32, #tpu.memory_space<vmem>>, vector<1x1x16x16xf32>
    %47 = vector.shape_cast %46 : vector<1x1x16x16xf32> to vector<16x16xf32>
    %48 = vector.shape_cast %45 : vector<16x16xf32> to vector<1x1x16x16xf32>
    tpu.vector_store %arg3[%c0_16, %c1, %c0_17, %c0_18], %48 {strides = array<i32>} : memref<1x4x16x16xf32, #tpu.memory_space<vmem>>, vector<1x1x16x16xf32>,
    %49 = vector.extract_strided_slice %36 {offsets = [2, 0, 0], sizes = [1, 16, 16], strides = [1, 1, 1]} : vector<4x16x16xf32> to vector<1x16x16xf32>
    %50 = vector.shape_cast %49 : vector<1x16x16xf32> to vector<16x16xf32>
    %cst_19 = arith.constant dense<0.000000e+00> : vector<16x16xf32>
    %51 = tpu.matmul %31, %50, %cst_19 {dimension_numbers = #tpu.dot_dimension_numbers<[1], [0], [0], [1], [0, 0, 1, 1], [], []>} : vector<16x16xf32>, vector<16x16xf32>, vector<16x16xf32> -> vector<16x16xf32>
    %c0_20 = arith.constant 0 : index
    %c2 = arith.constant 2 : index
    %c0_21 = arith.constant 0 : index
    %c0_22 = arith.constant 0 : index
    %52 = vector.load %arg3[%c0_20, %c2, %c0_21, %c0_22] : memref<1x4x16x16xf32, #tpu.memory_space<vmem>>, vector<1x1x16x16xf32>
    %53 = vector.shape_cast %52 : vector<1x1x16x16xf32> to vector<16x16xf32>
    %54 = vector.shape_cast %51 : vector<16x16xf32> to vector<1x1x16x16xf32>
    tpu.vector_store %arg3[%c0_20, %c2, %c0_21, %c0_22], %54 {strides = array<i32>} : memref<1x4x16x16xf32, #tpu.memory_space<vmem>>, vector<1x1x16x16xf32>,
    %55 = vector.extract_strided_slice %36 {offsets = [3, 0, 0], sizes = [1, 16, 16], strides = [1, 1, 1]} : vector<4x16x16xf32> to vector<1x16x16xf32>
    %56 = vector.shape_cast %55 : vector<1x16x16xf32> to vector<16x16xf32>
    %cst_23 = arith.constant dense<0.000000e+00> : vector<16x16xf32>
    %57 = tpu.matmul %31, %56, %cst_23 {dimension_numbers = #tpu.dot_dimension_numbers<[1], [0], [0], [1], [0, 0, 1, 1], [], []>} : vector<16x16xf32>, vector<16x16xf32>, vector<16x16xf32> -> vector<16x16xf32>
    %c0_24 = arith.constant 0 : index
    %c3 = arith.constant 3 : index
    %c0_25 = arith.constant 0 : index
    %c0_26 = arith.constant 0 : index
    %58 = vector.load %arg3[%c0_24, %c3, %c0_25, %c0_26] : memref<1x4x16x16xf32, #tpu.memory_space<vmem>>, vector<1x1x16x16xf32>
    %59 = vector.shape_cast %58 : vector<1x1x16x16xf32> to vector<16x16xf32>
    %60 = vector.shape_cast %57 : vector<16x16xf32> to vector<1x1x16x16xf32>
    tpu.vector_store %arg3[%c0_24, %c3, %c0_25, %c0_26], %60 {strides = array<i32>} : memref<1x4x16x16xf32, #tpu.memory_space<vmem>>, vector<1x1x16x16xf32>,
    return
  }
  func.func @transform_0(%arg0: i32, %arg1: memref<4xi32, #tpu.memory_space<smem>>) -> (i32, i32, i32, i32) {
    %c0_i32 = arith.constant 0 : i32
    %c0_i32_0 = arith.constant 0 : i32
    %c0_i32_1 = arith.constant 0 : i32
    %c0_i32_2 = arith.constant 0 : i32
    return %arg0, %c0_i32, %c0_i32_0, %c0_i32_1 : i32, i32, i32, i32
  }
  func.func @transform_1(%arg0: i32, %arg1: memref<4xi32, #tpu.memory_space<smem>>) -> (i32, i32, i32, i32) {
    %c0_i32 = arith.constant 0 : i32
    %c0_i32_0 = arith.constant 0 : i32
    %c0_i32_1 = arith.constant 0 : i32
    %c0_i32_2 = arith.constant 0 : i32
    return %arg0, %c0_i32, %c0_i32_0, %c0_i32_1 : i32, i32, i32, i32
  }
}

</mosaic_0001>

<bundles_post_ra>
// kernel: tpu_custom_call.1
= control target key start
LH: loop header
LB: loop body
LE: loop exit
PB: predicated region body
PF: predicated region fallthrough
CT: control target
= control target key end

     0   :  { %s1259_s0 = inlined_call_operand.hbm [shape: s32[4], index: 0, kind: input, shape index: {}]   ;;  %s1260_s1 = inlined_call_operand.hbm [shape: f32[2,4,16,16], index: 1, kind: input, shape index: {}]   ;;  %s1261_s2 = inlined_call_operand.hbm [shape: f32[2,4,16,16], index: 2, kind: output, shape index: {}]  }
   0x1   :  { %s912_s11 = scalar_lea.hbm %s1259_s0, 16 }
   0x2   :  { %p913_p0 = scmp.ne.s32.totalorder %s1259_s0, %s912_s11  ;;  %p916_p1 = scmp.lt.u32.totalorder %s912_s11, %s1259_s0 }
   0x4   :  { %p918_p2 = pnand %p916_p1, %p913_p0 }
   0x6   :  { %921 = shalt.err (!%p918_p2)  }
   0x7   :  { %s1022_s16 = smov [#allocation3]  }
   0x8   :  { %8 = dma.hbm_to_smem %s1259_s0, 16, %s1022_s16, [#allocation2] }
   0x9   :  { %996 = dma.done.wait [#allocation2], 16 }
   0xa   :  { %997 = vsyncadd [#allocation2], 4294967280 }
   0xb   :  { %10 = sfence }
   0xc   :  { %11 = vsyncpa [#allocation5], 0 }
   0xd   :  { %13 = vsyncpa [#allocation5 + $0x1], 0 }
   0xe   :  { %14 = vsyncpa [#allocation6], 0 }
   0xf   :  { %16 = vsyncpa [#allocation6 + $0x1], 0  ;;  %s1058_s19 = smov 0   ;;  %s1060_s20 = smov 0  }
  0x10   :  { %s1062_s21 = smov 0   ;;  %s1064_s22 = smov 0  }
  0x11 LB: > { %s1079_s0 = sadd.s32 4294967295, %s1020_s22   ;;  %s722_s23 = sadd.s32 4294967294, %s1020_s22   ;;  %s1020_s22 = sphi %s1064_s22, %s1274_s22   ;;  %s1016_s21 = sphi %s1062_s21, %s1273_s21   ;;  %s1012_s20 = sphi %s1060_s20, %s1272_s20   ;;  %s1008_s19 = sphi %s1058_s19, %s1271_s19  }
  0x12   : > { %s1083_s24 = sadd.s32 1, %s1020_s22   ;;  %s29_s25 = sadd.s32 1, %s1016_s21 }
  0x13   : > { %s26_s26 = ssub.s32 %s1020_s22, %s1083_s24  ;;  %p36_p3 = scmp.ne.s32.totalorder %s1016_s21, %s1012_s20 }
  0x14   : > { %p27_p4 = scmp.eq.s32.totalorder %s26_s26, 0  ;;  %p37_p5 = scmp.eq.s32.totalorder %s1020_s22, 0 }
  0x15   : > { %p42_p6 = scmp.ne.s32.totalorder %s1012_s20, %s1008_s19  ;;  %p43_p7 = scmp.eq.s32.totalorder %s1079_s0, 0 }
  0x16   : > { %s1095_s27 = scalar_select %p27_p4, %s1016_s21, %s29_s25  }
  0x17   : > { %p1097_p8 = por %p37_p5, %p36_p3  ;;  %p1101_p9 = por %p43_p7, %p42_p6 }
  0x18   : > { %p66_p10 = scmp.eq.s32.totalorder %s1079_s0, 1  ;;  %p72_p11 = scmp.eq.s32.totalorder %s722_s23, 1 }
  0x19   : > { %p871_p13 = scmp.lt.s32.totalorder %s1020_s22, 2  ;;  %s92_s4 = sand.u32 1, %s1016_s21  }
  0x1a   : > { %p1108_p0 = por %p66_p10, %p36_p3  ;;  %p1112_p1 = por %p72_p11, %p42_p6 }
  0x1b   : > { %s767_s5 = sshll.u32 %s1020_s22, 10  ;;  %s725_s6 = sshll.u32 %s92_s4, 6 }
  0x1c   : > { %s1265_s30 = scalar_select %p1108_p0, 1, 0 }
  0x1d   : > { %s1266_s3 = scalar_select %p1112_p1, 1, 0 }
  0x1e   : > { %s1121_s9 = scalar_lea.hbm %s1260_s1, %s767_s5  ;;  %s96_s10 = scalar_lea.vmem [#allocation4], %s725_s6 }
  0x1f   : > { %s103_s11 = sshll.u32 %s96_s10, 4  ;;  %p1125_p2 = pnand %p871_p13, %p1097_p8  ;;  %s1129_s11 = int_to_ptr.vmem [resolvable:$true] %s103_s11 }
  0x20   : > { %s1131_s13 = scalar_lea.sflag [#allocation5], %s92_s4  ;;  %s922_s14 = scalar_lea.hbm %s1121_s9, 1024 }
  0x21   : > { %p923_p3 = scmp.ne.s32.totalorder %s1121_s9, %s922_s14  ;;  %p924_p4 = pneg %p1125_p2 }
  0x22   : > { %s927_s17 = scalar_lea.hbm %s1260_s1, 2048  ;;  %p928_p7 = scmp.lt.u32.totalorder %s1121_s9, %s1260_s1 }
  0x23   : > { %p925_p5 = pnand %p924_p4, %p923_p3  ;;  %p929_p8 = scmp.lt.u32.totalorder %s927_s17, %s922_s14 }
  0x24   : > { %p931_p11 = scmp.lt.u32.totalorder %s922_s14, %s1121_s9 }
  0x25   : > { %p926_p6 = pneg %p925_p5  ;;  %p930_p10 = por %p929_p8, %p928_p7 }
  0x27   : > { %p932_p13 = por %p931_p11, %p930_p10 }
  0x29   : > { %p933_p12 = pnand %p932_p13, %p926_p6 }
  0x2b   : > { %936 = shalt.err (!%p933_p12)
}
  0x2c   : > { %s937_s25 = scalar_lea.vmem %s1129_s11, 1024  ;;  %s1023_s26 = smov [#allocation4]  }
  0x2d   : > { %p938_p3 = scmp.ne.s32.totalorder %s1129_s11, %s937_s25  ;;  %s942_s28 = sshll.u32 %s1023_s26, 4  ;;  %s943_s28 = int_to_ptr.vmem [resolvable:$false] %s942_s28 }
  0x2e   : > { %s944_s4 = scalar_lea.vmem %s943_s28, 2048  ;;  %p945_p0 = scmp.lt.s32.totalorder %s1129_s11, %s943_s28 }
  0x2f   : > { %p940_p5 = pnand %p938_p3, %p924_p4  ;;  %p946_p7 = scmp.lt.s32.totalorder %s944_s4, %s937_s25 }
  0x31   : > { %p941_p1 = pneg %p940_p5  ;;  %p947_p8 = por %p946_p7, %p945_p0 }
  0x33   : > { %p948_p10 = pnand %p947_p8, %p941_p1 }
  0x35   : > { %951 = shalt.err (!%p948_p10)
}
  0x36   : > { %s1024_s5 = smov 128   ;;  %s1025_s6 = smov 8  }
  0x37   : > { %866 = dma.hbm_to_vmem [thread:$0]  (!%p1125_p2), %s1121_s9, 1024, %s1129_s11, %s1131_s13, %s1024_s5, %s1024_s5, %s1025_s6  }
  0x38   : > { %p728_p12 = scmp.ge.s32.totalorder %s1020_s22, 1  ;;  %p111_p4 = scmp.lt.s32.totalorder %s1020_s22, 3 }
  0x3a   : > { %p112_p6 = pnand %p728_p12, %p111_p4 }
  0x3b   : > { %s1162_s7 = sand.u32 (!%p112_p6), 1, %s1012_s20  }
  0x3c   : > { %115 = sbr.rel (%p112_p6) target bundleno = 548 (0x224), region = 24  ;;  %s729_s8 = sshll.u32 (!%p112_p6), %s1162_s7, 6 }
  0x3d   : > { %s118_s10 = scalar_lea.sflag (!%p112_p6), [#allocation5], %s1162_s7  ;;  %s1168_s14 = scalar_lea.vmem (!%p112_p6), [#allocation4], %s729_s8 }
  0x43   : > { %999 = dma.done.wait (%p1101_p9), %s118_s10, 1024  }
  0x44   : > { %1001 = vsyncadd (%p1101_p9), %s118_s10, 4294966272  ;;  %s731_s9 = sshll.u32 %s1079_s0, 1  ;;  %v140_v0 = vlaneseq  ;;  %vm188_vm0 = vcmask 130048   ;;  %v180_v3 = vld [vmem:[%s1168_s14] sm:$0xff]  ;;  %v1026_v12 = vmov 1.0|1.0  }
  0x45   : > { %s146_s11 = sld [smem:[#allocation3 + %s731_s9]]  ;;  %s147_s12 = sadd.s32 1, %s731_s9  ;;  %799 = vmatprep.mubr.msk.f32.mxu0 %vm188_vm0, %v180_v3  ;;  %v181_v13 = vld [vmem:[%s1168_s14 + $0x8] sm:$0xff]  ;;  %v182_v14 = vld [vmem:[%s1168_s14 + $0x10] sm:$0xff]  ;;  %v183_v15 = vld [vmem:[%s1168_s14 + $0x18] sm:$0xff]  ;;  %v1027_v24 = vmov 0.0  }
  0x46   : > { %s148_s13 = sld [smem:[#allocation3 + %s147_s12]]  ;;  %v141_v1 = vshrl.u32 %v140_v0, 7  ;;  %v144_v2 = vand.u32 127, %v140_v0  ;;  %v184_v16 = vld [vmem:[%s1168_s14 + $0x20] sm:$0xff]  ;;  %v185_v17 = vld [vmem:[%s1168_s14 + $0x28] sm:$0xff]  ;;  %v186_v18 = vld [vmem:[%s1168_s14 + $0x30] sm:$0xff] }
  0x47   : > { %v187_v19 = vld [vmem:[%s1168_s14 + $0x38] sm:$0xff]  ;;  %s139_s29 = scalar_lea.vmem [#allocation7], %s729_s8  ;;  %s768_s18 = sshll.u32 %s1079_s0, 10 }
  0x48   : > { %v142_v4 = vadd.s32 8, %v141_v1  ;;  %s649_s17 = sshll.u32 %s139_s29, 4  ;;  %s1213_s26 = scalar_lea.hbm %s1261_s2, %s768_s18  ;;  %s1207_s17 = int_to_ptr.vmem [resolvable:$true] %s649_s17 }
  0x49   : > { %s636_s0 = scalar_lea.sflag [#allocation6], %s1162_s7  ;;  %s952_s28 = scalar_lea.vmem %s1207_s17, 1024 }
  0x4a   : > { %p953_p9 = scmp.ne.s32.totalorder %s1207_s17, %s952_s28  ;;  %p1268_p0 = scmp.ne.s32.totalorder %s1265_s30, 0 }
  0x4b   : > { %s732_s15 = sadd.s32 4294967292, %s146_s11  ;;  %s1028_s4 = smov [#allocation7]  }
  0x4c   : > { %v150_v5 = vstv %s732_s15  ;;  %s735_s16 = sadd.s32 4294967292, %s148_s13  ;;  %p954_p1 = pnand %p953_p9, %p1268_p0 }
  0x4d   : > { %v151_v6 = vadd.s32 %v150_v5, %v144_v2  ;;  %v163_v7 = vstv %s735_s16  ;;  %s956_s5 = sshll.u32 %s1028_s4, 4  ;;  %s957_s5 = int_to_ptr.vmem [resolvable:$false] %s956_s5 }
  0x4e   : > { %v164_v8 = vadd.s32 %v163_v7, %v141_v1  ;;  %v165_v9 = vadd.s32 %v163_v7, %v142_v4  ;;  %p955_p2 = pneg %p954_p1  ;;  %s958_s6 = scalar_lea.vmem %s957_s5, 2048 }
  0x4f   : > { %vm152_vm1 = vcmp.gt.s32.totalorder %v151_v6, 0  ;;  %p959_p11 = scmp.lt.s32.totalorder %s1207_s17, %s957_s5  ;;  %p960_p13 = scmp.lt.s32.totalorder %s958_s6, %s952_s28 }
  0x50   : > { %v153_v10 = vsel %vm152_vm1, %v151_v6, 0  ;;  %vm166_vm6 = vcmp.gt.s32.totalorder %v164_v8, 0  ;;  %vm168_vm7 = vcmp.gt.s32.totalorder %v165_v9, 0 }
  0x51   : > { %vm154_vm2 = vcmp.lt.s32.totalorder %v153_v10, 15  ;;  %v167_v20 = vsel %vm166_vm6, %v164_v8, 0  ;;  %v169_v21 = vsel %vm168_vm7, %v165_v9, 0  ;;  %p961_p3 = por %p960_p13, %p959_p11 }
  0x52   : > { %v155_v11 = vsel %vm154_vm2, %v153_v10, 15  ;;  %vm170_vm8 = vcmp.lt.s32.totalorder %v167_v20, 15  ;;  %vm172_vm9 = vcmp.lt.s32.totalorder %v169_v21, 15 }
  0x53   : > { %vm156_vm3 = vcmp.eq.s32.totalorder %v141_v1, %v155_v11  ;;  %vm157_vm4 = vcmp.eq.s32.totalorder %v142_v4, %v155_v11  ;;  %v171_v22 = vsel %vm170_vm8, %v167_v20, 15  ;;  %v173_v23 = vsel %vm172_vm9, %v169_v21, 15  ;;  %p962_p5 = pnand %p961_p3, %p955_p2 }
  0x54   : > { %vm839_vm5 = vmpackc.low %vm157_vm4, %vm156_vm3  ;;  %vm174_vm10 = vcmp.eq.s32.totalorder %v144_v2, %v171_v22  ;;  %vm175_vm11 = vcmp.eq.s32.totalorder %v144_v2, %v173_v23 }
  0x55   : > { %840 = vmatprep.subr.msk.bf16.mxu0 %vm839_vm5, %v1026_v12  ;;  %v736_v25 = vsel %vm174_vm10, 1.0, %v1027_v24  ;;  %v737_v26 = vsel %vm175_vm11, 1.0, %v1027_v24 }
  0x56   : > { %842 = vmatpush3.bf16.msk.msra.mxu0 %vm839_vm5, %v1026_v12  ;;  %815 = vmatprep.mubr.msk.f32.mxu1 %vm188_vm0, %v736_v25 }
  0x59   : > { %800 = vmatmul.mubr.msk.f32.vlgmr.msra.gmra.mrb[0].mxu0 %vm188_vm0, %v181_v13 }
  0x5a   : > { %802 = vmatprep.mubr.msk.f32.mxu0 %vm188_vm0, %v182_v14 }
  0x5d   : > { %803 = vmatmul.mubr.msk.f32.gmra.mrb[2].mxu0 %vm188_vm0, %v183_v15 }
  0x5e   : > { %805 = vmatprep.mubr.msk.f32.mxu0 %vm188_vm0, %v184_v16 }
  0x61   : > { %806 = vmatmul.mubr.msk.f32.gmra.mrb[4].mxu0 %vm188_vm0, %v185_v17 }
  0x62   : > { %808 = vmatprep.mubr.msk.f32.mxu0 %vm188_vm0, %v186_v18 }
  0x65   : > { %809 = vmatmul.mubr.msk.f32.gmra.mrb[6].mxu0 %vm188_vm0, %v187_v19 }
 0x12c   : > { %v801_v27 = vpop.f32.mrb[0].mxu0 }
 0x12d   : > { %v279_v28 = vpop.f32.mrb[1].mxu0 }
 0x12e   : > { %v843_v29 = vpack.c.bf16 %v801_v27, %v279_v28 }
 0x130   : > { %v804_v30 = vpop.f32.mrb[2].mxu0  ;;  %844 = vmatprep.subr.bf16.mxu1 %v843_v29 }
 0x131   : > { %v289_v31 = vpop.f32.mrb[3].mxu0  ;;  %846 = vmatpush3.bf16.msra.mxu1 %v843_v29 }
 0x132   : > { %v847_v32 = vpack.c.bf16 %v804_v30, %v289_v31 }
 0x134   : > { %v807_v33 = vpop.f32.mrb[4].mxu0  ;;  %816 = vmatmul.mubr.msk.f32.vlgmr.msra.gmra.mrb[0].mxu1 %vm188_vm0, %v737_v26  ;;  %848 = vmatprep.subr.bf16.mxu1 %v847_v32 }
 0x135   : > { %v299_v34 = vpop.f32.mrb[5].mxu0  ;;  %850 = vmatpush3.bf16.msra.mxu1 %v847_v32  ;;  %822 = vmatprep.mubr.msk.f32.mxu1 %vm188_vm0, %v736_v25 }
 0x136   : > { %v851_v35 = vpack.c.bf16 %v807_v33, %v299_v34 }
 0x138   : > { %v810_v36 = vpop.f32.mrb[6].mxu0  ;;  %823 = vmatmul.mubr.msk.f32.vlgmr.msra.gmra.mrb[2].mxu1 %vm188_vm0, %v737_v26  ;;  %852 = vmatprep.subr.bf16.mxu1 %v851_v35 }
 0x139   : > { %v309_v37 = vpop.f32.mrb[7].mxu0  ;;  %854 = vmatpush3.bf16.msra.mxu1 %v851_v35  ;;  %829 = vmatprep.mubr.msk.f32.mxu1 %vm188_vm0, %v736_v25 }
 0x13a   : > { %v855_v38 = vpack.c.bf16 %v810_v36, %v309_v37 }
 0x13c   : > { %830 = vmatmul.mubr.msk.f32.vlgmr.msra.gmra.mrb[4].mxu1 %vm188_vm0, %v737_v26  ;;  %856 = vmatprep.subr.bf16.mxu1 %v855_v38 }
 0x13d   : > { %858 = vmatpush3.bf16.msra.mxu1 %v855_v38  ;;  %836 = vmatprep.mubr.msk.f32.mxu1 %vm188_vm0, %v736_v25 }
 0x140   : > { %837 = vmatmul.mubr.msk.f32.vlgmr.msra.gmra.mrb[6].mxu1 %vm188_vm0, %v737_v26 }
 0x207   : > { %v817_v39 = vpop.f32.mrb[0].mxu1 }
 0x208   : > { %400 = vst.msk [vmem:[%s139_s29 + $0x8] sm:$0xff] %vm188_vm0, %v817_v39  ;;  %v390_v40 = vpop.f32.mrb[1].mxu1 }
 0x209   : > { %399 = vst.msk [vmem:[%s139_s29] sm:$0xff] %vm188_vm0, %v390_v40 }
 0x20b   : > { %v824_v41 = vpop.f32.mrb[2].mxu1 }
 0x20c   : > { %753 = vst.msk [vmem:[%s139_s29 + $0x18] sm:$0xff] %vm188_vm0, %v824_v41  ;;  %v467_v42 = vpop.f32.mrb[3].mxu1 }
 0x20d   : > { %752 = vst.msk [vmem:[%s139_s29 + $0x10] sm:$0xff] %vm188_vm0, %v467_v42 }
 0x20f   : > { %v831_v43 = vpop.f32.mrb[4].mxu1 }
 0x210   : > { %757 = vst.msk [vmem:[%s139_s29 + $0x28] sm:$0xff] %vm188_vm0, %v831_v43  ;;  %v545_v44 = vpop.f32.mrb[5].mxu1 }
 0x211   : > { %756 = vst.msk [vmem:[%s139_s29 + $0x20] sm:$0xff] %vm188_vm0, %v545_v44 }
 0x213   : > { %v838_v45 = vpop.f32.mrb[6].mxu1 }
 0x214   : > { %761 = vst.msk [vmem:[%s139_s29 + $0x38] sm:$0xff] %vm188_vm0, %v838_v45  ;;  %v623_v46 = vpop.f32.mrb[7].mxu1 }
 0x215   : > { %760 = vst.msk [vmem:[%s139_s29 + $0x30] sm:$0xff] %vm188_vm0, %v623_v46 }
 0x216   : > { %965 = shalt.err (!%p962_p5)
}
 0x217   : > { %s966_s8 = scalar_lea.hbm %s1213_s26, 1024  ;;  %s970_s9 = scalar_lea.hbm %s1261_s2, 2048 }
 0x218   : > { %p967_p7 = scmp.ne.s32.totalorder %s1213_s26, %s966_s8  ;;  %p971_p12 = scmp.lt.u32.totalorder %s1213_s26, %s1261_s2 }
 0x219   : > { %p972_p4 = scmp.lt.u32.totalorder %s970_s9, %s966_s8  ;;  %p974_p9 = scmp.lt.u32.totalorder %s966_s8, %s1213_s26 }
 0x21a   : > { %p968_p8 = pnand %p967_p7, %p1268_p0 }
 0x21b   : > { %p973_p6 = por %p972_p4, %p971_p12 }
 0x21c   : > { %p969_p10 = pneg %p968_p8 }
 0x21d   : > { %p975_p1 = por %p974_p9, %p973_p6 }
 0x21f   : > { %p976_p2 = pnand %p975_p1, %p969_p10 }
 0x221   : > { %979 = shalt.err (!%p976_p2)
}
 0x222   : > { %s1029_s13 = smov 128   ;;  %s1030_s15 = smov 8  }
 0x223   : > { %861 = dma.vmem_to_hbm [thread:$0]  (%p1268_p0), %s1207_s17, 1024, %s1213_s26, %s636_s0, %s1029_s13, %s1029_s13, %s1030_s15  }
 0x224 PF: > { %s664_s16 = sand.u32 1, %s1008_s19   ;;  %p1269_p11 = scmp.ne.s32.totalorder %s1266_s3, 0 }
 0x225   : > { %p1270_p13 = scmp.ge.s32.totalorder %s1020_s22, 2  ;;  %s665_s29 = scalar_lea.sflag [#allocation6], %s664_s16 }
 0x227   : > { %p868_p3 = pnand %p1270_p13, %p1269_p11 }
 0x229   : > { %1003 = dma.done.wait (!%p868_p3), %s665_s29, 1024  }
 0x22a   : > { %1005 = vsyncadd (!%p868_p3), %s665_s29, 4294966272  ;;  %p19_p5 = scmp.ge.s32.totalorder %s1083_s24, 4   ;;  %s1271_s19 = smov %s1012_s20 }
 0x22b   : > { %s1272_s20 = smov %s1016_s21  ;;  %s1273_s21 = smov %s1095_s27 }
 0x22c   : > { %s1274_s22 = smov %s1083_s24  ;;  %21 = sbr.rel (!%p19_p5) target bundleno = 17 (0x11), region = 72 }
 0x233   :  { %670 = vsyncpa [#allocation5], 1 }
 0x234   :  { %672 = vsyncpa [#allocation5 + $0x1], 1 }
 0x235   :  { %673 = vsyncpa [#allocation6], 1 }
 0x236   :  { %675 = vsyncpa [#allocation6 + $0x1], 1 }

</bundles_post_ra>
